<compile_context>
chip_gen: v6e
topology: v6e:2x2x1
jax: 0.10.0
libtpu: 0.0.40
codegen_flags: <defaults>
</compile_context>

<pallas_src>
import functools

import jax
import jax.numpy as jnp
from jax.experimental import pallas as pl
from jax.experimental.pallas import tpu as pltpu


def _make_ls_ce_kernel(smoothing: float, n_class: int, ignore_index, use_weights: bool):
    confidence = 1.0 - smoothing
    smooth_val = smoothing / (n_class - 1)
    coef_target = confidence - smooth_val     # extra mass on the target class

    def kernel(*refs):
        if use_weights:
            x_ref, t_ref, sw_ref, o_ref = refs
        else:
            x_ref, t_ref, o_ref = refs
            sw_ref = None

        x = x_ref[...].astype(jnp.float32)        # [TB, C] (native dtype in HBM)
        t = t_ref[...]                            # [TB, 1] int32

        # log-softmax pieces (lane-axis reductions).
        m = jnp.max(x, axis=-1, keepdims=True)
        shifted = x - m                                                    # [TB, C]
        lse = jnp.log(jnp.sum(jnp.exp(shifted), axis=-1, keepdims=True))   # [TB, 1]

        # logp[target] via one-hot masked reduce (no gather).
        col = jax.lax.broadcasted_iota(jnp.int32, x.shape, 1)
        shifted_t = jnp.sum(jnp.where(col == t, shifted, 0.0),
                            axis=-1, keepdims=True)                        # [TB, 1]
        logp_t = shifted_t - lse                                           # [TB, 1]

        # sum_j logp_j = sum_j shifted_j - C * lse
        sum_logp = (jnp.sum(shifted, axis=-1, keepdims=True)
                    - jnp.float32(n_class) * lse)                          # [TB, 1]

        loss = -(jnp.float32(coef_target) * logp_t
                 + jnp.float32(smooth_val) * sum_logp)                     # [TB, 1]

        if use_weights:
            loss = loss * sw_ref[...]                                      # [TB, 1]

        if ignore_index is not None:
            loss = jnp.where(t == jnp.int32(ignore_index), 0.0, loss)

        # Lane-dense store: (TB, 1) -> (1, TB).
        o_ref[...] = loss[:, 0][None, :]

    return kernel


@functools.partial(jax.jit,
                   static_argnames=("smoothing", "apply_class_weights",
                                    "ignore_index", "block_b"))
def label_smoothing_cross_entropy(x, target, weight=None, *,
                                  smoothing: float = 0.1,
                                  apply_class_weights: bool = False,
                                  ignore_index=None,
                                  block_b=None):
    """Per-sample label-smoothing cross-entropy. x: [B, C]; target: [B] or [B, C]."""
    assert 0.0 <= smoothing < 1.0
    if target.ndim == 2:
        if target.shape[1] != x.shape[1]:
            raise ValueError("Target tensor shape incompatible with logits shape")
        target = jnp.argmax(target, axis=1)
    elif target.ndim != 1:
        raise ValueError("Target must be 1D indices or [B, C] one-hot")
    target = target.astype(jnp.int32)

    B, C = x.shape
    assert C > 1, "label smoothing needs at least 2 classes"
    use_w = (weight is not None) and apply_class_weights

    # --- batch tile selection ------------------------------------------------
    itemsize = jnp.dtype(x.dtype).itemsize
    pack = max(8, 32 // max(itemsize, 1))       # 8 (f32), 16 (bf16), 32 (int8/fp8)
    if block_b is None:
        # Keep one logits buffer <= ~8 MiB so the double-buffered pipeline stays
        # well under the 64 MiB v7x VMEM ceiling (and comfortably inside the
        # raised scoped limit on v5e/v6e).
        max_rows = max(pack, (8 * 1024 * 1024) // (C * itemsize))
        tb = min(512, max_rows)
    else:
        tb = block_b
    tb = max(pack, (tb // pack) * pack)                      # sublane packing
    tb = min(tb, ((B + pack - 1) // pack) * pack)            # no point exceeding B
    num_tiles = pl.cdiv(B, tb)
    # TODO(synk): for very large vocab (C >= 32k) on v7x, add a C grid axis
    # ('arbitrary', last) with an online max/log-sum-exp accumulator in VMEM
    # scratch instead of loading whole rows.

    kernel = _make_ls_ce_kernel(smoothing, C, ignore_index, use_w)

    in_specs = [
        pl.BlockSpec((tb, C), lambda i: (i, 0)),   # logits tile (native dtype, e.g. bf16)
        pl.BlockSpec((tb, 1), lambda i: (i, 0)),   # target indices tile
    ]
    args = [x, target[:, None]]
    if use_w:
        # Gather weight[target] once with XLA; pass as a per-row column.
        sw = weight.astype(jnp.float32)[target]
        in_specs.append(pl.BlockSpec((tb, 1), lambda i: (i, 0)))
        args.append(sw[:, None])

    out = pl.pallas_call(
        kernel,
        out_shape=jax.ShapeDtypeStruct((num_tiles, tb), jnp.float32),
        grid_spec=pltpu.PrefetchScalarGridSpec(
            num_scalar_prefetch=0,
            grid=(num_tiles,),
            in_specs=in_specs,
            out_specs=pl.BlockSpec((1, tb), lambda i: (i, 0)),
        ),
        compiler_params=pltpu.CompilerParams(
            dimension_semantics=("parallel",),
            # Raised above the small v5e default; still below v7x's 64 MiB physical.
            vmem_limit_bytes=48 * 1024 * 1024),
    )(*args)
    # Rows past B in the tail tile were computed from out-of-bounds (garbage)
    # reads; drop them here.
    return out.reshape(-1)[:B]


def _reference(x, target, weight=None, *, smoothing=0.1,
               apply_class_weights=False, ignore_index=None):
    """Pure-JAX reference mirroring the PyTorch module."""
    if target.ndim == 2:
        target = jnp.argmax(target, axis=1)
    target = target.astype(jnp.int32)
    logp = jax.nn.log_softmax(x.astype(jnp.float32), axis=-1)
    n_class = x.shape[1]
    smooth = jnp.full_like(logp, smoothing / (n_class - 1))
    onehot = jax.nn.one_hot(target, n_class, dtype=bool)
    smooth = jnp.where(onehot, 1.0 - smoothing, smooth)
    loss = -jnp.sum(smooth * logp, axis=1)
    if ignore_index is not None:
        loss = jnp.where(target == ignore_index, 0.0, loss)
    if weight is not None and apply_class_weights:
        sw = weight[target]
        if ignore_index is not None:
            loss = jnp.where(target == ignore_index, 0.0, loss * sw)
        else:
            loss = loss * sw
    return loss


if __name__ == "__main__":
    key = jax.random.PRNGKey(0)
    k1, k2, k3, k4, k5 = jax.random.split(key, 5)

    # Small shapes consistent with the module's [B, C] logits contract.
    B, C = 16, 32
    x = jax.random.normal(k1, (B, C), dtype=jnp.float32)
    target = jax.random.randint(k2, (B,), 0, C, dtype=jnp.int32)
    class_weight = 0.5 + jax.random.uniform(k3, (C,), dtype=jnp.float32)

    # 1) Default config: smoothing=0.1, no weights, no ignore_index.
    out = jax.block_until_ready(label_smoothing_cross_entropy(x, target, smoothing=0.1))
    ref = _reference(x, target, smoothing=0.1)
    assert out.shape == (B,)
    assert jnp.allclose(out, ref, atol=1e-5, rtol=1e-5)

    # 2) Class weights + ignore_index (also exercises the [B, C] one-hot target path).
    target_oh = jax.nn.one_hot(target, C, dtype=jnp.float32)
    out_w = jax.block_until_ready(label_smoothing_cross_entropy(
        x, target_oh, class_weight,
        smoothing=0.1, apply_class_weights=True, ignore_index=3))
    ref_w = _reference(x, target_oh, class_weight,
                       smoothing=0.1, apply_class_weights=True, ignore_index=3)
    assert jnp.allclose(out_w, ref_w, atol=1e-5, rtol=1e-5)

    # 3) Non-divisible batch exercising the cdiv grid + partial tail tile.
    B2, C2 = 50, 40
    x2 = jax.random.normal(k4, (B2, C2), dtype=jnp.float32)
    t2 = jax.random.randint(k5, (B2,), 0, C2, dtype=jnp.int32)
    out2 = jax.block_until_ready(label_smoothing_cross_entropy(
        x2, t2, smoothing=0.2, block_b=16))
    ref2 = _reference(x2, t2, smoothing=0.2)
    assert out2.shape == (B2,)
    assert jnp.allclose(out2, ref2, atol=1e-5, rtol=1e-5)

    print("KERNEL_OK")
</pallas_src>

<mosaic_0001>
module attributes {stable_mosaic.version = 11 : i64} {
  func.func @kernel(%arg0: i32, %arg1: memref<16x32xf32, #tpu.memory_space<vmem>>, %arg2: memref<16x1xi32, #tpu.memory_space<vmem>>, %arg3: memref<1x16xf32, #tpu.memory_space<vmem>>) attributes {dimension_semantics = [#tpu.dimension_semantics<parallel>], iteration_bounds = array<i64: 1>, scalar_prefetch = 0 : i64, scratch_operands = 0 : i64, tpu.core_type = #tpu.core_type<tc>, window_params = [{transform_indices = @transform_0, window_bounds = array<i64: 16, 32>}, {transform_indices = @transform_1, window_bounds = array<i64: 16, 1>}, {transform_indices = @transform_2, window_bounds = array<i64: 1, 16>}]} {
    %c0 = arith.constant 0 : index
    %c0_0 = arith.constant 0 : index
    %0 = vector.load %arg1[%c0, %c0_0] : memref<16x32xf32, #tpu.memory_space<vmem>>, vector<16x32xf32>
    %c0_1 = arith.constant 0 : index
    %c0_2 = arith.constant 0 : index
    %1 = vector.load %arg2[%c0_1, %c0_2] : memref<16x1xi32, #tpu.memory_space<vmem>>, vector<16x1xi32>
    %cst = arith.constant dense<0xFF800000> : vector<16xf32>
    %2 = vector.multi_reduction <maximumf>, %0, %cst [1] : vector<16x32xf32> to vector<16xf32>
    %3 = vector.shape_cast %2 : vector<16xf32> to vector<16x1xf32>
    %4 = vector.broadcast %3 : vector<16x1xf32> to vector<16x32xf32>
    %5 = arith.subf %0, %4 : vector<16x32xf32>
    %6 = math.exp %5 : vector<16x32xf32>
    %cst_3 = arith.constant dense<0.000000e+00> : vector<16xf32>
    %7 = vector.multi_reduction <add>, %6, %cst_3 [1] : vector<16x32xf32> to vector<16xf32>
    %8 = vector.shape_cast %7 : vector<16xf32> to vector<16x1xf32>
    %9 = math.log %8 : vector<16x1xf32>
    %10 = tpu.iota {dimensions = array<i32: 1>} : vector<16x32xi32>
    %11 = vector.broadcast %1 : vector<16x1xi32> to vector<16x32xi32>
    %12 = arith.cmpi eq, %10, %11 : vector<16x32xi32>
    %cst_4 = arith.constant 0.000000e+00 : f32
    %13 = vector.broadcast %cst_4 : f32 to vector<16x32xf32>
    %14 = arith.select %12, %5, %13 : vector<16x32xi1>, vector<16x32xf32>
    %cst_5 = arith.constant dense<0.000000e+00> : vector<16xf32>
    %15 = vector.multi_reduction <add>, %14, %cst_5 [1] : vector<16x32xf32> to vector<16xf32>
    %16 = vector.shape_cast %15 : vector<16xf32> to vector<16x1xf32>
    %17 = arith.subf %16, %9 : vector<16x1xf32>
    %cst_6 = arith.constant dense<0.000000e+00> : vector<16xf32>
    %18 = vector.multi_reduction <add>, %5, %cst_6 [1] : vector<16x32xf32> to vector<16xf32>
    %19 = vector.shape_cast %18 : vector<16xf32> to vector<16x1xf32>
    %cst_7 = arith.constant 3.200000e+01 : f32
    %20 = vector.broadcast %cst_7 : f32 to vector<16x1xf32>
    %21 = arith.mulf %20, %9 : vector<16x1xf32>
    %22 = arith.subf %19, %21 : vector<16x1xf32>
    %cst_8 = arith.constant 0.896774172 : f32
    %23 = vector.broadcast %cst_8 : f32 to vector<16x1xf32>
    %24 = arith.mulf %23, %17 : vector<16x1xf32>
    %cst_9 = arith.constant 0.0032258064 : f32
    %25 = vector.broadcast %cst_9 : f32 to vector<16x1xf32>
    %26 = arith.mulf %25, %22 : vector<16x1xf32>
    %27 = arith.addf %24, %26 : vector<16x1xf32>
    %cst_10 = arith.constant 0.000000e+00 : f32
    %28 = vector.broadcast %cst_10 : f32 to vector<16x1xf32>
    %29 = arith.subf %28, %27 : vector<16x1xf32>
    %30 = vector.shape_cast %29 : vector<16x1xf32> to vector<16xf32>
    %31 = vector.shape_cast %30 : vector<16xf32> to vector<1x16xf32>
    %c0_11 = arith.constant 0 : index
    %c0_12 = arith.constant 0 : index
    %32 = vector.load %arg3[%c0_11, %c0_12] : memref<1x16xf32, #tpu.memory_space<vmem>>, vector<1x16xf32>
    tpu.vector_store %arg3[%c0_11, %c0_12], %31 {strides = array<i32>} : memref<1x16xf32, #tpu.memory_space<vmem>>, vector<1x16xf32>,
    return
  }
  func.func @transform_0(%arg0: i32) -> (i32, i32) {
    %c0_i32 = arith.constant 0 : i32
    %c0_i32_0 = arith.constant 0 : i32
    return %arg0, %c0_i32 : i32, i32
  }
  func.func @transform_1(%arg0: i32) -> (i32, i32) {
    %c0_i32 = arith.constant 0 : i32
    %c0_i32_0 = arith.constant 0 : i32
    return %arg0, %c0_i32 : i32, i32
  }
  func.func @transform_2(%arg0: i32) -> (i32, i32) {
    %c0_i32 = arith.constant 0 : i32
    %c0_i32_0 = arith.constant 0 : i32
    return %arg0, %c0_i32 : i32, i32
  }
}

</mosaic_0001>

<bundles_post_ra>
// kernel: label_smoothing_cross_entropy.1
= control target key start
LH: loop header
LB: loop body
LE: loop exit
PB: predicated region body
PF: predicated region fallthrough
CT: control target
= control target key end

     0   :  { %vm16_vm0 = vcmask 261120   ;;  %v141_v4 = vmov 0   ;;  %s181_s0 = inlined_call_operand.vmem [shape: f32[16,32], index: 0, kind: input, shape index: {}]   ;;  %s182_s1 = inlined_call_operand.vmem [shape: s32[16,1], index: 1, kind: input, shape index: {}]   ;;  %s183_s2 = inlined_call_operand.hbm [shape: f32[1,16], index: 2, kind: output, shape index: {}]  }
   0x1   :  { %v12_v0 = vld [vmem:[%s181_s0] sm:$0xff]  ;;  %v13_v1 = vld [vmem:[%s181_s0 + $0x8] sm:$0xff]  ;;  %109 = vset.pattern.permute.xlu1 %v141_v4  ;;  %110 = vset.pattern.permute.xlu0 %v141_v4 }
   0x2   :  { %v14_v2 = vld [vmem:[%s182_s1] sm:$0xff]  ;;  %v17_v3 = vsel %vm16_vm0, %v12_v0, -inf }
   0x3   :  { %7 = vsyncpa [#allocation3], 0  ;;  %18 = vmax.xlane.f32.xlu0 %v17_v3  ;;  %42 = vperm.xlu1 %109, %v14_v2   ;;  %v20_v5 = vsel %vm16_vm0, %v13_v1, -inf  ;;  %v15_v6 = vld [vmem:[%s182_s1 + $0x8] sm:$0xff]  ;;  %v39_v13 = vlaneseq  ;;  %s142_s0 = smov [#allocation2]   ;;  %vm88_vm3 = vcmask 130112  }
   0x4   :  { %s99_s1 = sshll.u32 %s142_s0, 4  ;;  %vm91_vm4 = vcmask 122880   ;;  %s100_s1 = int_to_ptr.vmem [resolvable:$true] %s99_s1 }
   0x5   :  { %v40_v15 = vand.u32 127, %v39_v13  ;;  %v80_v44 = vshrl.u32 %v39_v13, 7  ;;  %s119_s17 = scalar_lea.vmem %s100_s1, 16  ;;  %s123_s18 = scalar_lea.vmem %s100_s1, 32 }
   0x6   :  { %p120_p0 = scmp.ne.s32.totalorder %s100_s1, %s119_s17  ;;  %p124_p1 = scmp.lt.s32.totalorder %s100_s1, %s100_s1 }
   0x7   :  { %21 = vmax.xlane.f32.xlu0 %v20_v5  ;;  %45 = vperm.xlu1 %109, %v15_v6   ;;  %v83_v46 = vadd.s32 4294967288, %v40_v15  ;;  %v81_v50 = vsub.s32 %v40_v15, %v80_v44  ;;  %p125_p2 = scmp.lt.s32.totalorder %s123_s18, %s119_s17 }
   0x9   :  { %v86_v52 = vsub.s32 %v83_v46, %v80_v44  ;;  %p126_p3 = por %p125_p2, %p124_p1 }
   0xb   :  { %p127_p4 = pnand %p126_p3, %p120_p0 }
  0x7e   :  { %v43_v14 = vpop.permute.xlu1 %42 }
  0x7f   :  { %vm47_vm1 = vcmp.eq.s32.totalorder %v40_v15, %v43_v14 }
  0x82   :  { %v46_v17 = vpop.permute.xlu1 %45 }
  0x83   :  { %vm48_vm2 = vcmp.eq.s32.totalorder %v40_v15, %v46_v17 }
  0x8c   :  { %v19_v7 = vpop.xlane.xlu0 %18 }
  0x8d   :  { %v23_v8 = vsub.f32 %v12_v0, %v19_v7 }
  0x8f   :  { %v25_v9 = vmul.f32 1.442695, %v23_v8  ;;  %v49_v19 = vsel %vm47_vm1, %v23_v8, 0.0  ;;  %v59_v25 = vsel %vm16_vm0, %v23_v8, 0.0 }
  0x90   :  { %v22_v10 = vpop.xlane.xlu0 %21  ;;  %v51_v21 = vsel %vm16_vm0, %v49_v19, 0.0 }
  0x91   :  { %111 = vpow2.f32 %v25_v9  ;;  %v24_v11 = vsub.f32 %v13_v1, %v22_v10 }
  0x93   :  { %v27_v12 = vmul.f32 1.442695, %v24_v11  ;;  %v50_v23 = vsel %vm48_vm2, %v24_v11, 0.0  ;;  %v62_v26 = vsel %vm16_vm0, %v24_v11, 0.0 }
  0x94   :  { %v54_v24 = vsel %vm16_vm0, %v50_v23, 0.0 }
  0x95   :  { %113 = vpow2.f32 %v27_v12 }
  0x9e   :  { %v112_v16 = vpop.eup %111 }
  0x9f   :  { %v29_v18 = vsel %vm16_vm0, %v112_v16, 0.0 }
  0xa0   :  { %30 = vadd.xlane.f32.xlu0 %v29_v18 }
  0xa2   :  { %v114_v20 = vpop.eup %113 }
  0xa3   :  { %v32_v22 = vsel %vm16_vm0, %v114_v20, 0.0 }
  0xa4   :  { %52 = vadd.xlane.f32.xlu0 %v51_v21  ;;  %33 = vadd.xlane.f32.xlu1 %v32_v22 }
  0xa8   :  { %55 = vadd.xlane.f32.xlu0 %v54_v24 }
  0xac   :  { %60 = vadd.xlane.f32.xlu0 %v59_v25 }
  0xb0   :  { %63 = vadd.xlane.f32.xlu0 %v62_v26 }
 0x129   :  { %v31_v27 = vpop.xlane.xlu0 %30 }
 0x12a   :  { %115 = vlog2.f32 %v31_v27 }
 0x12d   :  { %v34_v28 = vpop.xlane.xlu1 %33  ;;  %v53_v29 = vpop.xlane.xlu0 %52 }
 0x12e   :  { %117 = vlog2.f32 %v34_v28 }
 0x131   :  { %v56_v30 = vpop.xlane.xlu0 %55 }
 0x135   :  { %v61_v33 = vpop.xlane.xlu0 %60 }
 0x137   :  { %v116_v31 = vpop.eup %115 }
 0x138   :  { %v36_v32 = vmul.f32 0.6931472, %v116_v31 }
 0x139   :  { %v64_v43 = vpop.xlane.xlu0 %63 }
 0x13a   :  { %v57_v34 = vsub.f32 %v53_v29, %v36_v32  ;;  %v65_v35 = vmul.f32 32.0, %v36_v32 }
 0x13b   :  { %v118_v36 = vpop.eup %117 }
 0x13c   :  { %v38_v37 = vmul.f32 0.6931472, %v118_v36  ;;  %v67_v38 = vsub.f32 %v61_v33, %v65_v35  ;;  %v69_v39 = vmul.f32 0.8967742, %v57_v34 }
 0x13e   :  { %v58_v40 = vsub.f32 %v56_v30, %v38_v37  ;;  %v71_v41 = vmul.f32 0.0032258064, %v67_v38  ;;  %v66_v42 = vmul.f32 32.0, %v38_v37 }
 0x140   :  { %v73_v45 = vadd.f32 %v71_v41, %v69_v39  ;;  %v68_v47 = vsub.f32 %v64_v43, %v66_v42  ;;  %v70_v48 = vmul.f32 0.8967742, %v58_v40 }
 0x142   :  { %v72_v49 = vmul.f32 0.0032258064, %v68_v47  ;;  %v75_v51 = vsub.f32 0.0, %v73_v45 }
 0x144   :  { %v74_v53 = vadd.f32 %v72_v49, %v70_v48  ;;  %v82_v55 = vrot.slane %v75_v51, %v81_v50 }
 0x146   :  { %v76_v54 = vsub.f32 0.0, %v74_v53 }
 0x148   :  { %v87_v56 = vrot.slane %v76_v54, %v86_v52 }
 0x14a   :  { %v89_v57 = vsel %vm88_vm3, %v87_v56, %v82_v55 }
 0x14b   :  { %92 = vst.msk [vmem:[#allocation2] sm:$0x1] %vm91_vm4, %v89_v57 }
 0x14c   :  { %130 = shalt.err (!%p127_p4)
}
 0x14d   :  { %102 = dma.vmem_to_hbm [thread:$0]  %s100_s1, 16, %s183_s2, [#allocation3]  }
 0x14e   :  { %139 = dma.done.wait [#allocation3], 16  }
 0x14f   :  { %140 = vsyncadd [#allocation3], 4294967280 }
 0x150   :  { %106 = vsyncpa [#allocation3], 1 }

</bundles_post_ra>
